<compile_context>
chip_gen: v6e
topology: v6e:2x2x1
jax: 0.10.0
libtpu: 0.0.40
codegen_flags: <defaults>
</compile_context>

<pallas_src>
import functools

import jax
import jax.numpy as jnp
from jax.experimental import pallas as pl
from jax.experimental.pallas import tpu as pltpu

_INV_SQRT2 = 0.7071067811865476
_SQRT_2_OVER_PI = 0.7978845608028654


def _gelu(y, approximate):
    if approximate:
        # tanh approximation: runs on the EUP (own VLIW slot) -> keeps kernel HBM-bound.
        return 0.5 * y * (1.0 + jnp.tanh(_SQRT_2_OVER_PI * (y + 0.044715 * y * y * y)))
    # Exact erf GELU (PyTorch nn.GELU() default).
    return 0.5 * y * (1.0 + jax.lax.erf(y * _INV_SQRT2))


def ablock_kernel(x_ref, scale_ref, shift_ref, o_ref, *, approximate):
    # Fused BN affine-apply + GELU; purely elementwise. Dropout(p) in eval mode = identity.
    x = x_ref[...].astype(jnp.float32)        # (TN, TM)
    s = scale_ref[...].astype(jnp.float32)    # (1, TM), sublane-broadcast against x
    b = shift_ref[...].astype(jnp.float32)    # (1, TM)
    y = x * s + b                             # BN: gamma*(x-mean)*rsqrt(var+eps)+beta
    o_ref[...] = _gelu(y, approximate).astype(o_ref.dtype)


def _chip_budget():
    """(target block elems, vmem_limit_bytes) tuned per TPU generation."""
    try:
        kind = jax.devices()[0].device_kind.lower()
    except Exception:  # pragma: no cover - defensive
        kind = ""
    if "v5 lite" in kind or "v5e" in kind or "v5litepod" in kind:
        return 1 << 19, None        # ~2 MiB blocks; stay under the 16 MiB scoped default
    if "v6" in kind or "trillium" in kind:
        return 1 << 21, 64 << 20    # ~8 MiB blocks; 128 MiB physical VMEM
    if "v7" in kind:
        return 1 << 20, 40 << 20    # ~4 MiB blocks; 64 MiB physical VMEM
    return 1 << 19, None            # unknown / older chip: conservative


def _pick_tiles(N, M, target_elems):
    """Pick (tn, tm) for a (N, M) flattened array.

    Block dims are always either the full array extent or multiples of (8, 128),
    so ragged cdiv grids stay legal.
    """
    # Lane tile: large multiple of 128 when possible (unmasked vector stores).
    lane_cap = max(128, (target_elems // 8) // 128 * 128)
    if M % 128 == 0:
        tm = min(M, lane_cap)
    elif M <= target_elems:
        tm = M                      # full-extent last dim (legal for any size)
    else:
        tm = lane_cap               # ragged last block, still lane-dense
    # Sublane/batch tile from the remaining VMEM budget; must be N or a multiple of 8.
    budget = max(1, target_elems // tm)
    if N <= budget or N <= 8:
        tn = N
    else:
        tn = max(8, (budget // 8) * 8)
    # Ensure moderately-sized inputs yield >= 2 grid points so both v7x TensorCores
    # get work (tiny inputs stay at grid=(1, 1)).
    if pl.cdiv(M, tm) == 1 and pl.cdiv(N, tn) == 1 and N * M > (1 << 17):
        if tm >= 256 and tm % 256 == 0:
            tm //= 2
        elif N > 8:
            tn = max(8, ((tn // 2) // 8) * 8)
    return tn, tm


def ablock_forward(x, gamma, beta, running_mean, running_var, eps=1e-5, approximate=False):
    """x: (N, C, L). Returns gelu(batchnorm1d(x)); Dropout is identity (eval mode)."""
    N, C, L = x.shape
    M = C * L

    # Fold BN running stats + affine into per-channel scale/shift (plain-JAX glue),
    # then pre-broadcast along L so the kernel sees lane-dense (1, C*L) operands.
    scale = gamma.astype(jnp.float32) / jnp.sqrt(running_var.astype(jnp.float32) + eps)
    shift = beta.astype(jnp.float32) - running_mean.astype(jnp.float32) * scale
    scale_row = jnp.broadcast_to(scale[:, None], (C, L)).reshape(1, M)
    shift_row = jnp.broadcast_to(shift[:, None], (C, L)).reshape(1, M)
    x2 = x.reshape(N, M)

    target_elems, vmem_limit = _chip_budget()
    tn, tm = _pick_tiles(N, M, target_elems)
    # m is the OUTER grid axis / n the inner one: consecutive steps keep the same
    # scale/shift block index, so those tiny operands are not re-DMA'd per step.
    grid = (pl.cdiv(M, tm), pl.cdiv(N, tn))

    itemsize = jnp.dtype(x.dtype).itemsize
    cost = pl.CostEstimate(
        flops=8 * N * M,
        transcendentals=N * M,
        bytes_accessed=2 * N * M * itemsize + 2 * M * 4,
    )

    out2 = pl.pallas_call(
        functools.partial(ablock_kernel, approximate=approximate),
        out_shape=jax.ShapeDtypeStruct((N, M), x.dtype),
        grid=grid,
        in_specs=[
            pl.BlockSpec((tn, tm), lambda m, n: (n, m)),
            pl.BlockSpec((1, tm), lambda m, n: (0, m)),
            pl.BlockSpec((1, tm), lambda m, n: (0, m)),
        ],
        out_specs=pl.BlockSpec((tn, tm), lambda m, n: (n, m)),
        compiler_params=pltpu.CompilerParams(
            dimension_semantics=("parallel", "parallel"),
            vmem_limit_bytes=vmem_limit,
        ),
        cost_estimate=cost,
    )(x2, scale_row, shift_row)
    return out2.reshape(N, C, L)


def reference_forward(x, gamma, beta, running_mean, running_var, eps=1e-5, approximate=False):
    # Pure-JAX reference (eval-mode BN + GELU + identity Dropout).
    xn = (x - running_mean[None, :, None]) / jnp.sqrt(running_var[None, :, None] + eps)
    y = gamma[None, :, None] * xn + beta[None, :, None]
    return _gelu(y, approximate)


if __name__ == "__main__":
    key = jax.random.PRNGKey(0)
    k_x, k_g, k_b, k_m, k_v = jax.random.split(key, 5)

    N, g, L = 2, 4, 16  # batch=2, channels(g)=4, length=16
    x = jax.random.normal(k_x, (N, g, L), dtype=jnp.float32)

    # Deterministic synthetic BN parameters / running stats.
    gamma = 1.0 + 0.1 * jax.random.normal(k_g, (g,), dtype=jnp.float32)
    beta = 0.1 * jax.random.normal(k_b, (g,), dtype=jnp.float32)
    running_mean = 0.1 * jax.random.normal(k_m, (g,), dtype=jnp.float32)
    running_var = 1.0 + 0.1 * jax.random.uniform(k_v, (g,), dtype=jnp.float32)

    # 1) Exact erf-GELU (matches PyTorch nn.GELU() default).
    out = jax.block_until_ready(ablock_forward(x, gamma, beta, running_mean, running_var))
    ref = reference_forward(x, gamma, beta, running_mean, running_var, approximate=False)
    assert out.shape == (N, g, L)
    assert jnp.allclose(out, ref, atol=1e-5, rtol=1e-5), "exact-GELU mismatch vs reference"

    # 2) tanh-approx GELU (EUP path, per perf review) vs matching tanh reference,
    #    plus a bound on its deviation from the exact-erf output (~1e-3 abs).
    out_a = jax.block_until_ready(
        ablock_forward(x, gamma, beta, running_mean, running_var, approximate=True))
    ref_a = reference_forward(x, gamma, beta, running_mean, running_var, approximate=True)
    assert jnp.allclose(out_a, ref_a, atol=1e-5, rtol=1e-5), "tanh-GELU mismatch vs reference"
    assert float(jnp.max(jnp.abs(out_a - ref))) < 5e-3, "tanh-GELU drifted too far from exact"

    # 3) bf16 I/O smoke test (kernel math stays f32; halves HBM bytes on real workloads).
    out_bf = jax.block_until_ready(
        ablock_forward(x.astype(jnp.bfloat16), gamma, beta, running_mean, running_var))
    assert out_bf.dtype == jnp.bfloat16
    assert jnp.allclose(out_bf.astype(jnp.float32), ref, atol=5e-2, rtol=5e-2), "bf16 mismatch"

    print("KERNEL_OK")
</pallas_src>

<mosaic_0001>
module attributes {stable_mosaic.version = 11 : i64} {
  func.func @ablock_kernel(%arg0: i32, %arg1: i32, %arg2: memref<2x64xf32, #tpu.memory_space<vmem>>, %arg3: memref<1x64xf32, #tpu.memory_space<vmem>>, %arg4: memref<1x64xf32, #tpu.memory_space<vmem>>, %arg5: memref<2x64xf32, #tpu.memory_space<vmem>>) attributes {dimension_semantics = [#tpu.dimension_semantics<parallel>, #tpu.dimension_semantics<parallel>], iteration_bounds = array<i64: 1, 1>, scalar_prefetch = 0 : i64, scratch_operands = 0 : i64, tpu.core_type = #tpu.core_type<tc>, window_params = [{transform_indices = @transform_0, window_bounds = array<i64: 2, 64>}, {transform_indices = @transform_1, window_bounds = array<i64: 1, 64>}, {transform_indices = @transform_2, window_bounds = array<i64: 1, 64>}, {transform_indices = @transform_3, window_bounds = array<i64: 2, 64>}]} {
    %c0 = arith.constant 0 : index
    %c0_0 = arith.constant 0 : index
    %0 = vector.load %arg2[%c0, %c0_0] : memref<2x64xf32, #tpu.memory_space<vmem>>, vector<2x64xf32>
    %c0_1 = arith.constant 0 : index
    %c0_2 = arith.constant 0 : index
    %1 = vector.load %arg3[%c0_1, %c0_2] : memref<1x64xf32, #tpu.memory_space<vmem>>, vector<1x64xf32>
    %c0_3 = arith.constant 0 : index
    %c0_4 = arith.constant 0 : index
    %2 = vector.load %arg4[%c0_3, %c0_4] : memref<1x64xf32, #tpu.memory_space<vmem>>, vector<1x64xf32>
    %3 = vector.broadcast %1 : vector<1x64xf32> to vector<2x64xf32>
    %4 = arith.mulf %0, %3 : vector<2x64xf32>
    %5 = vector.broadcast %2 : vector<1x64xf32> to vector<2x64xf32>
    %6 = arith.addf %4, %5 : vector<2x64xf32>
    %cst = arith.constant 5.000000e-01 : f32
    %7 = vector.broadcast %cst : f32 to vector<2x64xf32>
    %8 = arith.mulf %7, %6 : vector<2x64xf32>
    %cst_5 = arith.constant 0.707106769 : f32
    %9 = vector.broadcast %cst_5 : f32 to vector<2x64xf32>
    %10 = arith.mulf %6, %9 : vector<2x64xf32>
    %11 = math.erf %10 : vector<2x64xf32>
    %cst_6 = arith.constant 1.000000e+00 : f32
    %12 = vector.broadcast %cst_6 : f32 to vector<2x64xf32>
    %13 = arith.addf %12, %11 : vector<2x64xf32>
    %14 = arith.mulf %8, %13 : vector<2x64xf32>
    %c0_7 = arith.constant 0 : index
    %c0_8 = arith.constant 0 : index
    %15 = vector.load %arg5[%c0_7, %c0_8] : memref<2x64xf32, #tpu.memory_space<vmem>>, vector<2x64xf32>
    tpu.vector_store %arg5[%c0_7, %c0_8], %14 {strides = array<i32>} : memref<2x64xf32, #tpu.memory_space<vmem>>, vector<2x64xf32>,
    return
  }
  func.func @transform_0(%arg0: i32, %arg1: i32) -> (i32, i32) {
    %c0_i32 = arith.constant 0 : i32
    return %arg1, %arg0 : i32, i32
  }
  func.func @transform_1(%arg0: i32, %arg1: i32) -> (i32, i32) {
    %c0_i32 = arith.constant 0 : i32
    %c0_i32_0 = arith.constant 0 : i32
    return %c0_i32, %arg0 : i32, i32
  }
  func.func @transform_2(%arg0: i32, %arg1: i32) -> (i32, i32) {
    %c0_i32 = arith.constant 0 : i32
    %c0_i32_0 = arith.constant 0 : i32
    return %c0_i32, %arg0 : i32, i32
  }
  func.func @transform_3(%arg0: i32, %arg1: i32) -> (i32, i32) {
    %c0_i32 = arith.constant 0 : i32
    return %arg1, %arg0 : i32, i32
  }
}

</mosaic_0001>

<bundles_post_ra>
// kernel: tpu_custom_call.1
= control target key start
LH: loop header
LB: loop body
LE: loop exit
PB: predicated region body
PF: predicated region fallthrough
CT: control target
= control target key end

     0   :  { %8 = vsyncpa [#allocation3], 0  ;;  %s150_s0 = inlined_call_operand.hbm [shape: f32[2,64], index: 0, kind: input, shape index: {}]   ;;  %s151_s1 = inlined_call_operand.vmem [shape: f32[1,64], index: 1, kind: input, shape index: {}]   ;;  %s152_s2 = inlined_call_operand.vmem [shape: f32[1,64], index: 2, kind: input, shape index: {}]   ;;  %s153_s3 = inlined_call_operand.hbm [shape: f32[2,64], index: 3, kind: output, shape index: {}]  }
   0x1   :  { %9 = vsyncpa [#allocation4], 0  ;;  %s116_s12 = smov [#allocation2]  }
   0x2   :  { %s16_s13 = sshll.u32 %s116_s12, 4  ;;  %s17_s13 = int_to_ptr.vmem [resolvable:$true] %s16_s13 }
   0x3   :  { %s80_s14 = scalar_lea.vmem %s17_s13, 32  ;;  %p85_p1 = scmp.lt.s32.totalorder %s17_s13, %s17_s13 }
   0x4   :  { %p81_p0 = scmp.ne.s32.totalorder %s17_s13, %s80_s14  ;;  %p86_p2 = scmp.lt.s32.totalorder %s80_s14, %s80_s14 }
   0x6   :  { %p87_p3 = por %p86_p2, %p85_p1 }
   0x8   :  { %p88_p4 = pnand %p87_p3, %p81_p0 }
   0xa   :  { %91 = shalt.err (!%p88_p4)
}
   0xb   :  { %19 = dma.hbm_to_vmem [thread:$0]  %s150_s0, 32, %s17_s13, [#allocation3]  }
   0xc   :  { %112 = dma.done.wait [#allocation3], 32  }
   0xd   :  { %113 = vsyncadd [#allocation3], 4294967264  ;;  %v27_v0 = vld [vmem:[#allocation2] sm:$0x3]  ;;  %s117_s21 = smov [#allocation5]   ;;  %vm49_vm0 = vcmask 517120  }
   0xe   :  { %v66_v1 = vld [vmem:[%s151_s1] ss:$0 sm:$0xff]  ;;  %s57_s22 = sshll.u32 %s117_s21, 4  ;;  %s58_s22 = int_to_ptr.vmem [resolvable:$true] %s57_s22 }
   0xf   :  { %v67_v2 = vld [vmem:[%s152_s2] ss:$0 sm:$0xff]  ;;  %v36_v3 = vmul.f32 %v66_v1, %v27_v0  ;;  %s92_s0 = scalar_lea.vmem %s58_s22, 32  ;;  %p97_p6 = scmp.lt.s32.totalorder %s58_s22, %s58_s22 }
  0x10   :  { %p93_p5 = scmp.ne.s32.totalorder %s58_s22, %s92_s0  ;;  %p98_p7 = scmp.lt.s32.totalorder %s92_s0, %s92_s0 }
  0x11   :  { %v43_v4 = vadd.f32 %v67_v2, %v36_v3 }
  0x12   :  { %p99_p8 = por %p98_p7, %p97_p6 }
  0x13   :  { %v45_v5 = vmul.f32 0.70710677, %v43_v4  ;;  %v44_v6 = vmul.f32 0.5, %v43_v4 }
  0x14   :  { %p100_p9 = pnand %p99_p8, %p93_p5 }
  0x15   :  { %70 = verf.f32 %v45_v5 }
  0x22   :  { %v71_v7 = vpop.eup %70 }
  0x23   :  { %v47_v8 = vadd.f32 1.0, %v71_v7 }
  0x25   :  { %v48_v9 = vmul.f32 %v47_v8, %v44_v6 }
  0x27   :  { %50 = vst.msk [vmem:[#allocation5] sm:$0x3] %vm49_vm0, %v48_v9 }
  0x28   :  { %103 = shalt.err (!%p100_p9)
}
  0x29   :  { %60 = dma.vmem_to_hbm [thread:$0]  %s58_s22, 32, %s153_s3, [#allocation4]  }
  0x2a   :  { %114 = dma.done.wait [#allocation4], 32  }
  0x2b   :  { %115 = vsyncadd [#allocation4], 4294967264 }
  0x2c   :  { %64 = vsyncpa [#allocation3], 1 }
  0x2d   :  { %65 = vsyncpa [#allocation4], 1 }

</bundles_post_ra>
